<compile_context>
chip_gen: v6e
topology: v6e:2x2x1
jax: 0.10.0
libtpu: 0.0.40
codegen_flags: <defaults>
</compile_context>

<pallas_src>
import functools
import math

import jax
import jax.numpy as jnp
from jax.experimental import pallas as pl
from jax.experimental.pallas import tpu as pltpu

LANES = 128
MAX_TM = 4096          # rows per block -> (4096, 128) f32 = 2 MiB per input


def _round_up(x, m):
    return ((x + m - 1) // m) * m


def _num_tensorcores():
    """2 on multi-TensorCore chips (v7x); 1 on single-TC v5e/v6e."""
    try:
        kind = jax.devices()[0].device_kind.lower()
    except Exception:
        return 1
    return 2 if "v7" in kind else 1


def _focal_sum_kernel(sr_ref, gt_ref, out_ref, *, gamma, n_valid, tm, n_inner,
                      hard_targets):
    """Accumulates the sum of per-element focal loss into a (1, 8, 128) block."""
    c = pl.program_id(0)
    i = pl.program_id(1)

    @pl.when(i == 0)
    def _():
        out_ref[...] = jnp.zeros_like(out_ref)

    x = sr_ref[...].astype(jnp.float32)     # logits
    y = gt_ref[...].astype(jnp.float32)     # targets

    # Numerically stable BCE-with-logits (matches torch.nn.BCEWithLogitsLoss):
    #   bce = max(x, 0) - x*y + log1p(exp(-|x|))
    e = jnp.exp(-jnp.abs(x))
    bce = jnp.maximum(x, 0.0) - x * y + jnp.log1p(e)

    if hard_targets:
        # Exact for y in {0, 1}:  exp(-(max(x,0) - x*y)) = 1 if x*(2y-1) >= 0
        # else e, hence pt = exp(-bce) = that / (1 + e).  Saves one EUP exp.
        num = jnp.where(x * (2.0 * y - 1.0) >= 0.0, 1.0, e)
        pt = num * pl.reciprocal(1.0 + e, approx=True)
    else:
        pt = jnp.exp(-bce)      # exact for soft labels

    fl = (1.0 - pt) ** gamma * bce          # alpha applied to the scalar result

    block_elems = tm * LANES
    # NOTE: int32 scalar math; wrapper rejects tensors with >= 2^31 elements.
    block_start = (c * n_inner + i) * block_elems

    def accum(vals):
        # (tm, 128) -> (tm//8, 8, 128), reduce leading axis: accumulator stays
        # a full-sublane, lane-dense (8, 128) block.
        partial = vals.reshape(tm // 8, 8, LANES).sum(axis=0)
        out_ref[...] += partial[None]

    # Fast path: block is entirely within the valid prefix.
    @pl.when(block_start + block_elems <= n_valid)
    def _():
        accum(fl)

    # Slow path: ragged / duplicated boundary block -> mask invalid lanes.
    @pl.when(block_start + block_elems > n_valid)
    def _():
        row_idx = jax.lax.broadcasted_iota(jnp.int32, (tm, LANES), 0)
        col_idx = jax.lax.broadcasted_iota(jnp.int32, (tm, LANES), 1)
        flat_idx = block_start + row_idx * LANES + col_idx
        accum(jnp.where(flat_idx < n_valid, fl, 0.0))


def binary_focal_loss(sr, gt, alpha=1.0, gamma=4, size_average=True,
                      hard_targets=True):
    """Pallas TPU implementation of BinaryFocalLoss.forward.

    hard_targets=True enables the exact-for-{0,1}-labels pt rewrite that saves
    one exp per element; pass False for soft labels.
    """
    n = int(math.prod(sr.shape))
    if n == 0:
        return jnp.float32(0.0)
    if n >= 2 ** 31:
        # TODO(synk): int64/SMEM offset handling for >= 2^31-element tensors.
        raise NotImplementedError(
            "binary_focal_loss: >= 2**31 elements not supported (int32 offsets)")

    gamma_c = int(gamma) if float(gamma).is_integer() else float(gamma)

    sr_flat = sr.reshape(-1)                 # native dtype, no astype copies
    gt_flat = gt.reshape(-1)

    rows = n // LANES
    if rows < 8:
        rows = 0                             # tiny input -> plain-JAX path only
    n_body = rows * LANES

    total = jnp.float32(0.0)

    if rows > 0:
        ncores = _num_tensorcores()
        per_core_rows = -(-rows // ncores)
        tm = max(8, min(MAX_TM, _round_up(per_core_rows, 16), (rows // 8) * 8))
        total_blocks = -(-rows // tm)
        n_inner = -(-total_blocks // ncores)

        # Zero-copy when n % 128 == 0 (common case): reshape of a contiguous
        # flat array is free.  Otherwise slice the 128-aligned prefix (at most
        # one copy per input; strictly cheaper than padding both full inputs).
        if n_body == n:
            sr2d = sr_flat.reshape(rows, LANES)
            gt2d = gt_flat.reshape(rows, LANES)
        else:
            sr2d = sr_flat[:n_body].reshape(rows, LANES)
            gt2d = gt_flat[:n_body].reshape(rows, LANES)

        kernel = functools.partial(
            _focal_sum_kernel, gamma=gamma_c, n_valid=n_body, tm=tm,
            n_inner=n_inner, hard_targets=bool(hard_targets))

        def row_block_map(c, i):
            # Clamp so a trailing core never indexes a fully out-of-range
            # block; duplicated blocks are zeroed by the in-kernel mask.
            return (jnp.minimum(c * n_inner + i, total_blocks - 1), 0)

        bytes_in = (sr2d.size * sr2d.dtype.itemsize
                    + gt2d.size * gt2d.dtype.itemsize)
        cost = pl.CostEstimate(
            flops=16 * n_body,
            transcendentals=3 * n_body,          # exp, log1p, reciprocal
            bytes_accessed=bytes_in + ncores * 8 * LANES * 4,
        )

        partial_sums = pl.pallas_call(
            kernel,
            out_shape=jax.ShapeDtypeStruct((ncores, 8, LANES), jnp.float32),
            grid_spec=pltpu.PrefetchScalarGridSpec(
                num_scalar_prefetch=0,
                grid=(ncores, n_inner),
                in_specs=[
                    pl.BlockSpec((tm, LANES), row_block_map),
                    pl.BlockSpec((tm, LANES), row_block_map),
                ],
                out_specs=pl.BlockSpec((1, 8, LANES), lambda c, i: (c, 0, 0)),
            ),
            compiler_params=pltpu.CompilerParams(
                dimension_semantics=("parallel", "arbitrary"),
            ),
            cost_estimate=cost,
        )(sr2d, gt2d)
        total = total + jnp.sum(partial_sums)

    if n_body < n:
        # Ragged tail (< 128 elements, or the whole tiny input): plain JAX,
        # exact exp(-bce) form regardless of hard_targets.
        xt = sr_flat[n_body:].astype(jnp.float32)
        yt = gt_flat[n_body:].astype(jnp.float32)
        bce_t = (jnp.maximum(xt, 0.0) - xt * yt
                 + jnp.log1p(jnp.exp(-jnp.abs(xt))))
        pt_t = jnp.exp(-bce_t)
        total = total + jnp.sum((1.0 - pt_t) ** gamma_c * bce_t)

    total = jnp.float32(alpha) * total       # alpha hoisted out of the kernel
    if size_average:
        return total / jnp.float32(n)
    return total


def binary_focal_loss_ref(sr, gt, alpha=1.0, gamma=4, size_average=True):
    """Pure-JAX reference (mirrors the PyTorch forward)."""
    x = sr.astype(jnp.float32)
    y = gt.astype(jnp.float32)
    bce = jnp.maximum(x, 0.0) - x * y + jnp.log1p(jnp.exp(-jnp.abs(x)))
    pt = jnp.exp(-bce)
    fl = alpha * (1.0 - pt) ** gamma * bce
    return jnp.mean(fl) if size_average else jnp.sum(fl)


if __name__ == "__main__":
    key = jax.random.PRNGKey(0)
    k_sr, k_gt = jax.random.split(key)
    B, C, H, W = 2, 4, 16, 16

    SR = jax.random.normal(k_sr, (B, C, H, W), dtype=jnp.float32)   # logits
    GT = jax.random.bernoulli(k_gt, 0.4, (B, C, H, W)).astype(jnp.float32)

    loss = jax.block_until_ready(
        binary_focal_loss(SR, GT, alpha=1.0, gamma=4, size_average=True))
    ref = jax.block_until_ready(
        binary_focal_loss_ref(SR, GT, alpha=1.0, gamma=4, size_average=True))

    err = abs(float(loss) - float(ref))
    assert err <= 1e-4 + 1e-3 * abs(float(ref)), (float(loss), float(ref))
    print("KERNEL_OK")
</pallas_src>

<mosaic_0001>
module attributes {stable_mosaic.version = 11 : i64} {
  func.func @_focal_sum_kernel(%arg0: i32, %arg1: i32, %arg2: memref<16x128xf32, #tpu.memory_space<vmem>>, %arg3: memref<16x128xf32, #tpu.memory_space<vmem>>, %arg4: memref<1x8x128xf32, #tpu.memory_space<vmem>>) attributes {dimension_semantics = [#tpu.dimension_semantics<parallel>, #tpu.dimension_semantics<arbitrary>], iteration_bounds = array<i64: 1, 1>, scalar_prefetch = 0 : i64, scratch_operands = 0 : i64, tpu.core_type = #tpu.core_type<tc>, window_params = [{transform_indices = @transform_0, window_bounds = array<i64: 16, 128>}, {transform_indices = @transform_1, window_bounds = array<i64: 16, 128>}, {transform_indices = @transform_2, window_bounds = array<i64: 1, 8, 128>}]} {
    %c0_i32 = arith.constant 0 : i32
    %0 = arith.cmpi eq, %arg1, %c0_i32 : i32
    %1 = arith.extui %0 : i1 to i32
    %c0_i32_0 = arith.constant 0 : i32
    %2 = arith.cmpi ne, %1, %c0_i32_0 : i32
    scf.if %2 {
      %cst_17 = arith.constant 0.000000e+00 : f32
      %44 = vector.broadcast %cst_17 : f32 to vector<1x8x128xf32>
      %c0_18 = arith.constant 0 : index
      %c0_19 = arith.constant 0 : index
      %c0_20 = arith.constant 0 : index
      %45 = vector.load %arg4[%c0_18, %c0_19, %c0_20] : memref<1x8x128xf32, #tpu.memory_space<vmem>>, vector<1x8x128xf32>
      tpu.vector_store %arg4[%c0_18, %c0_19, %c0_20], %44 {strides = array<i32>} : memref<1x8x128xf32, #tpu.memory_space<vmem>>, vector<1x8x128xf32>,
    } else {
    }
    %c0 = arith.constant 0 : index
    %c0_1 = arith.constant 0 : index
    %3 = vector.load %arg2[%c0, %c0_1] : memref<16x128xf32, #tpu.memory_space<vmem>>, vector<16x128xf32>
    %c0_2 = arith.constant 0 : index
    %c0_3 = arith.constant 0 : index
    %4 = vector.load %arg3[%c0_2, %c0_3] : memref<16x128xf32, #tpu.memory_space<vmem>>, vector<16x128xf32>
    %5 = math.absf %3 : vector<16x128xf32>
    %cst = arith.constant 0.000000e+00 : f32
    %6 = vector.broadcast %cst : f32 to vector<16x128xf32>
    %7 = arith.subf %6, %5 : vector<16x128xf32>
    %8 = math.exp %7 : vector<16x128xf32>
    %cst_4 = arith.constant 0.000000e+00 : f32
    %9 = vector.broadcast %cst_4 : f32 to vector<16x128xf32>
    %10 = arith.maximumf %3, %9 : vector<16x128xf32>
    %11 = arith.mulf %3, %4 : vector<16x128xf32>
    %12 = arith.subf %10, %11 : vector<16x128xf32>
    %13 = math.log1p %8 : vector<16x128xf32>
    %14 = arith.addf %12, %13 : vector<16x128xf32>
    %cst_5 = arith.constant 2.000000e+00 : f32
    %15 = vector.broadcast %cst_5 : f32 to vector<16x128xf32>
    %16 = arith.mulf %15, %4 : vector<16x128xf32>
    %cst_6 = arith.constant 1.000000e+00 : f32
    %17 = vector.broadcast %cst_6 : f32 to vector<16x128xf32>
    %18 = arith.subf %16, %17 : vector<16x128xf32>
    %19 = arith.mulf %3, %18 : vector<16x128xf32>
    %cst_7 = arith.constant 0.000000e+00 : f32
    %20 = vector.broadcast %cst_7 : f32 to vector<16x128xf32>
    %21 = arith.cmpf oge, %19, %20 : vector<16x128xf32>
    %cst_8 = arith.constant 1.000000e+00 : f32
    %22 = vector.broadcast %cst_8 : f32 to vector<16x128xf32>
    %23 = arith.select %21, %22, %8 : vector<16x128xi1>, vector<16x128xf32>
    %cst_9 = arith.constant 1.000000e+00 : f32
    %24 = vector.broadcast %cst_9 : f32 to vector<16x128xf32>
    %25 = arith.addf %24, %8 : vector<16x128xf32>
    %26 = tpu.reciprocal %25 {approx = true} : vector<16x128xf32> -> vector<16x128xf32>
    %27 = arith.mulf %23, %26 : vector<16x128xf32>
    %cst_10 = arith.constant 1.000000e+00 : f32
    %28 = vector.broadcast %cst_10 : f32 to vector<16x128xf32>
    %29 = arith.subf %28, %27 : vector<16x128xf32>
    %30 = arith.mulf %29, %29 : vector<16x128xf32>
    %31 = arith.mulf %30, %30 : vector<16x128xf32>
    %32 = arith.mulf %31, %14 : vector<16x128xf32>
    %c1_i32 = arith.constant 1 : i32
    %33 = arith.muli %arg0, %c1_i32 : i32
    %34 = arith.addi %33, %arg1 : i32
    %c2048_i32 = arith.constant 2048 : i32
    %35 = arith.muli %34, %c2048_i32 : i32
    %c2048_i32_11 = arith.constant 2048 : i32
    %36 = arith.addi %35, %c2048_i32_11 : i32
    %c2048_i32_12 = arith.constant 2048 : i32
    %37 = arith.cmpi sle, %36, %c2048_i32_12 : i32
    %38 = arith.extui %37 : i1 to i32
    %c0_i32_13 = arith.constant 0 : i32
    %39 = arith.cmpi ne, %38, %c0_i32_13 : i32
    scf.if %39 {
      %44 = vector.shape_cast %32 : vector<16x128xf32> to vector<2x8x128xf32>
      %cst_17 = arith.constant dense<0.000000e+00> : vector<8x128xf32>
      %45 = vector.multi_reduction <add>, %44, %cst_17 [0] : vector<2x8x128xf32> to vector<8x128xf32>
      %c0_18 = arith.constant 0 : index
      %c0_19 = arith.constant 0 : index
      %c0_20 = arith.constant 0 : index
      %46 = vector.load %arg4[%c0_18, %c0_19, %c0_20] : memref<1x8x128xf32, #tpu.memory_space<vmem>>, vector<1x8x128xf32>
      %47 = vector.shape_cast %45 : vector<8x128xf32> to vector<1x8x128xf32>
      %48 = arith.addf %46, %47 : vector<1x8x128xf32>
      %c0_21 = arith.constant 0 : index
      %c0_22 = arith.constant 0 : index
      %c0_23 = arith.constant 0 : index
      %49 = vector.load %arg4[%c0_21, %c0_22, %c0_23] : memref<1x8x128xf32, #tpu.memory_space<vmem>>, vector<1x8x128xf32>
      tpu.vector_store %arg4[%c0_21, %c0_22, %c0_23], %48 {strides = array<i32>} : memref<1x8x128xf32, #tpu.memory_space<vmem>>, vector<1x8x128xf32>,
    } else {
    }
    %c2048_i32_14 = arith.constant 2048 : i32
    %40 = arith.addi %35, %c2048_i32_14 : i32
    %c2048_i32_15 = arith.constant 2048 : i32
    %41 = arith.cmpi sgt, %40, %c2048_i32_15 : i32
    %42 = arith.extui %41 : i1 to i32
    %c0_i32_16 = arith.constant 0 : i32
    %43 = arith.cmpi ne, %42, %c0_i32_16 : i32
    scf.if %43 {
      %44 = tpu.iota {dimensions = array<i32: 0>} : vector<16x128xi32>
      %45 = tpu.iota {dimensions = array<i32: 1>} : vector<16x128xi32>
      %c128_i32 = arith.constant 128 : i32
      %46 = vector.broadcast %c128_i32 : i32 to vector<16x128xi32>
      %47 = arith.muli %44, %46 : vector<16x128xi32>
      %48 = vector.broadcast %35 : i32 to vector<16x128xi32>
      %49 = arith.addi %48, %47 : vector<16x128xi32>
      %50 = arith.addi %49, %45 : vector<16x128xi32>
      %c2048_i32_17 = arith.constant 2048 : i32
      %51 = vector.broadcast %c2048_i32_17 : i32 to vector<16x128xi32>
      %52 = arith.cmpi slt, %50, %51 : vector<16x128xi32>
      %cst_18 = arith.constant 0.000000e+00 : f32
      %53 = vector.broadcast %cst_18 : f32 to vector<16x128xf32>
      %54 = arith.select %52, %32, %53 : vector<16x128xi1>, vector<16x128xf32>
      %55 = vector.shape_cast %54 : vector<16x128xf32> to vector<2x8x128xf32>
      %cst_19 = arith.constant dense<0.000000e+00> : vector<8x128xf32>
      %56 = vector.multi_reduction <add>, %55, %cst_19 [0] : vector<2x8x128xf32> to vector<8x128xf32>
      %c0_20 = arith.constant 0 : index
      %c0_21 = arith.constant 0 : index
      %c0_22 = arith.constant 0 : index
      %57 = vector.load %arg4[%c0_20, %c0_21, %c0_22] : memref<1x8x128xf32, #tpu.memory_space<vmem>>, vector<1x8x128xf32>
      %58 = vector.shape_cast %56 : vector<8x128xf32> to vector<1x8x128xf32>
      %59 = arith.addf %57, %58 : vector<1x8x128xf32>
      %c0_23 = arith.constant 0 : index
      %c0_24 = arith.constant 0 : index
      %c0_25 = arith.constant 0 : index
      %60 = vector.load %arg4[%c0_23, %c0_24, %c0_25] : memref<1x8x128xf32, #tpu.memory_space<vmem>>, vector<1x8x128xf32>
      tpu.vector_store %arg4[%c0_23, %c0_24, %c0_25], %59 {strides = array<i32>} : memref<1x8x128xf32, #tpu.memory_space<vmem>>, vector<1x8x128xf32>,
    } else {
    }
    return
  }
  func.func @transform_0(%arg0: i32, %arg1: i32) -> (i32, i32) {
    %c1_i32 = arith.constant 1 : i32
    %0 = arith.muli %arg0, %c1_i32 : i32
    %1 = arith.addi %0, %arg1 : i32
    %c0_i32 = arith.constant 0 : i32
    %2 = arith.minsi %1, %c0_i32 : i32
    %c0_i32_0 = arith.constant 0 : i32
    %c0_i32_1 = arith.constant 0 : i32
    return %2, %c0_i32_0 : i32, i32
  }
  func.func @transform_1(%arg0: i32, %arg1: i32) -> (i32, i32) {
    %c1_i32 = arith.constant 1 : i32
    %0 = arith.muli %arg0, %c1_i32 : i32
    %1 = arith.addi %0, %arg1 : i32
    %c0_i32 = arith.constant 0 : i32
    %2 = arith.minsi %1, %c0_i32 : i32
    %c0_i32_0 = arith.constant 0 : i32
    %c0_i32_1 = arith.constant 0 : i32
    return %2, %c0_i32_0 : i32, i32
  }
  func.func @transform_2(%arg0: i32, %arg1: i32) -> (i32, i32, i32) {
    %c0_i32 = arith.constant 0 : i32
    %c0_i32_0 = arith.constant 0 : i32
    %c0_i32_1 = arith.constant 0 : i32
    return %arg0, %c0_i32, %c0_i32_0 : i32, i32, i32
  }
}

</mosaic_0001>

<bundles_post_ra>
// kernel: tpu_custom_call.1
= control target key start
LH: loop header
LB: loop body
LE: loop exit
PB: predicated region body
PF: predicated region fallthrough
CT: control target
= control target key end

     0   :  { %7 = vsyncpa [#allocation3], 0  ;;  %s297_s0 = inlined_call_operand.hbm [shape: f32[16,128], index: 0, kind: input, shape index: {}]   ;;  %s298_s1 = inlined_call_operand.hbm [shape: f32[16,128], index: 1, kind: input, shape index: {}]   ;;  %s299_s2 = inlined_call_operand.hbm [shape: f32[1,8,128], index: 2, kind: output, shape index: {}]  }
   0x1   :  { %8 = vsyncpa [#allocation6], 0 }
   0x2   :  { %9 = vsyncpa [#allocation4], 0  ;;  %s268_s9 = smov [#allocation2]  }
   0x3   :  { %s21_s10 = sshll.u32 %s268_s9, 4  ;;  %s22_s10 = int_to_ptr.vmem [resolvable:$true] %s21_s10 }
   0x4   :  { %s210_s11 = scalar_lea.vmem %s22_s10, 256  ;;  %p215_p1 = scmp.lt.s32.totalorder %s22_s10, %s22_s10 }
   0x5   :  { %p211_p0 = scmp.ne.s32.totalorder %s22_s10, %s210_s11  ;;  %p216_p2 = scmp.lt.s32.totalorder %s210_s11, %s210_s11 }
   0x7   :  { %p217_p3 = por %p216_p2, %p215_p1 }
   0x9   :  { %p218_p4 = pnand %p217_p3, %p211_p0 }
   0xb   :  { %221 = shalt.err (!%p218_p4)
}
   0xc   :  { %s269_s12 = smov 128   ;;  %s270_s13 = smov 8  }
   0xd   :  { %27 = dma.hbm_to_vmem [thread:$0]  %s297_s0, 256, %s22_s10, [#allocation3], %s269_s12, %s269_s12, %s270_s13  }
   0xe   :  { %s271_s16 = smov [#allocation5]  }
   0xf   :  { %s39_s17 = sshll.u32 %s271_s16, 4  ;;  %s40_s17 = int_to_ptr.vmem [resolvable:$true] %s39_s17 }
  0x10   :  { %s230_s18 = scalar_lea.vmem %s40_s17, 256  ;;  %p235_p6 = scmp.lt.s32.totalorder %s40_s17, %s40_s17 }
  0x11   :  { %p231_p5 = scmp.ne.s32.totalorder %s40_s17, %s230_s18  ;;  %p236_p7 = scmp.lt.s32.totalorder %s230_s18, %s230_s18 }
  0x13   :  { %p237_p8 = por %p236_p7, %p235_p6 }
  0x15   :  { %p238_p9 = pnand %p237_p8, %p231_p5 }
  0x17   :  { %241 = shalt.err (!%p238_p9)
}
  0x18   :  { %45 = dma.hbm_to_vmem [thread:$0]  %s298_s1, 256, %s40_s17, [#allocation6], %s269_s12, %s269_s12, %s270_s13  }
  0x19   :  { %262 = dma.done.wait [#allocation3], 256  }
  0x1a   :  { %263 = vsyncadd [#allocation3], 4294967040 }
  0x1b   :  { %264 = dma.done.wait [#allocation6], 256  }
  0x1c   :  { %265 = vsyncadd [#allocation6], 4294967040  ;;  %v65_v0 = vld [vmem:[#allocation2] sm:$0xff]  ;;  %v66_v1 = vld [vmem:[#allocation2 + $0x8] sm:$0xff]  ;;  %s272_s0 = smov [#allocation7]  }
  0x1d   :  { %v69_v2 = vand.u32 2147483647, %v65_v0  ;;  %v70_v3 = vand.u32 2147483647, %v66_v1  ;;  %v67_v8 = vld [vmem:[#allocation5] sm:$0xff]  ;;  %v68_v9 = vld [vmem:[#allocation5 + $0x8] sm:$0xff] }
  0x1e   :  { %v103_v13 = vmul.f32 2.0, %v67_v8  ;;  %v104_v15 = vmul.f32 2.0, %v68_v9  ;;  %v77_v26 = vmax.f32 %v65_v0, 0.0  ;;  %v79_v27 = vmul.f32 %v67_v8, %v65_v0  ;;  %s168_s1 = sshll.u32 %s272_s0, 4  ;;  %s169_s1 = int_to_ptr.vmem [resolvable:$true] %s168_s1 }
  0x1f   :  { %v71_v4 = vsub.f32 0.0, %v69_v2  ;;  %v72_v5 = vsub.f32 0.0, %v70_v3  ;;  %v78_v29 = vmax.f32 %v66_v1, 0.0  ;;  %v80_v30 = vmul.f32 %v68_v9, %v66_v1  ;;  %s242_s21 = scalar_lea.vmem %s169_s1, 128  ;;  %p247_p11 = scmp.lt.s32.totalorder %s169_s1, %s169_s1 }
  0x20   :  { %v182_v16 = vadd.f32 -1.0, %v103_v13  ;;  %v183_v17 = vadd.f32 -1.0, %v104_v15  ;;  %v81_v40 = vsub.f32 %v77_v26, %v79_v27  ;;  %p243_p10 = scmp.ne.s32.totalorder %s169_s1, %s242_s21  ;;  %p248_p12 = scmp.lt.s32.totalorder %s242_s21, %s242_s21 }
  0x21   :  { %v73_v6 = vmul.f32 1.442695, %v71_v4  ;;  %v75_v7 = vmul.f32 1.442695, %v72_v5  ;;  %v82_v42 = vsub.f32 %v78_v29, %v80_v30 }
  0x22   :  { %v107_v20 = vmul.f32 %v182_v16, %v65_v0  ;;  %v108_v21 = vmul.f32 %v183_v17, %v66_v1  ;;  %p249_p13 = por %p248_p12, %p247_p11 }
  0x23   :  { %190 = vpow2.f32 %v73_v6 }
  0x24   :  { %192 = vpow2.f32 %v75_v7  ;;  %vm109_vm0 = vcmp.ge.f32.partialorder %v107_v20, 0.0  ;;  %vm110_vm1 = vcmp.ge.f32.partialorder %v108_v21, 0.0  ;;  %p250_p0 = pnand %p249_p13, %p243_p10 }
  0x30   :  { %v191_v10 = vpop.eup %190 }
  0x31   :  { %v193_v11 = vpop.eup %192  ;;  %v83_v12 = vadd.f32 1.0, %v191_v10  ;;  %v86_v18 = vmul.f32 -0.5, %v191_v10  ;;  %v89_v23 = vand.u32 2147483647, %v191_v10  ;;  %v111_v32 = vsel %vm109_vm0, 1.0, %v191_v10 }
  0x32   :  { %v92_v14 = vadd.f32 1.0, %v193_v11  ;;  %v95_v19 = vmul.f32 -0.5, %v193_v11  ;;  %v98_v25 = vand.u32 2147483647, %v193_v11  ;;  %v112_v36 = vsel %vm110_vm1, 1.0, %v193_v11 }
  0x33   :  { %194 = vlog2.f32 %v83_v12  ;;  %v87_v22 = vadd.f32 1.0, %v86_v18  ;;  %vm90_vm2 = vcmp.lt.f32.partialorder %v89_v23, 0.0004427343 }
  0x34   :  { %196 = vlog2.f32 %v92_v14  ;;  %v96_v24 = vadd.f32 1.0, %v95_v19  ;;  %vm99_vm3 = vcmp.lt.f32.partialorder %v98_v25, 0.0004427343 }
  0x35   :  { %198 = vrcp.f32 %v83_v12  ;;  %v88_v31 = vmul.f32 %v191_v10, %v87_v22 }
  0x36   :  { %200 = vrcp.f32 %v92_v14  ;;  %v97_v35 = vmul.f32 %v193_v11, %v96_v24 }
  0x40   :  { %v195_v28 = vpop.eup %194 }
  0x41   :  { %v197_v33 = vpop.eup %196  ;;  %v85_v34 = vmul.f32 0.6931472, %v195_v28 }
  0x42   :  { %v199_v37 = vpop.eup %198  ;;  %v94_v38 = vmul.f32 0.6931472, %v197_v33 }
  0x43   :  { %v201_v39 = vpop.eup %200  ;;  %v117_v41 = vmul.f32 %v199_v37, %v111_v32  ;;  %v91_v43 = vsel %vm90_vm2, %v88_v31, %v85_v34 }
  0x44   :  { %v118_v44 = vmul.f32 %v201_v39, %v112_v36  ;;  %v100_v45 = vsel %vm99_vm3, %v97_v35, %v94_v38  ;;  %v101_v48 = vadd.f32 %v91_v43, %v81_v40 }
  0x45   :  { %v119_v46 = vsub.f32 1.0, %v117_v41  ;;  %v102_v50 = vadd.f32 %v100_v45, %v82_v42 }
  0x46   :  { %v120_v47 = vsub.f32 1.0, %v118_v44 }
  0x47   :  { %v121_v49 = vmul.f32 %v119_v46, %v119_v46 }
  0x48   :  { %v122_v51 = vmul.f32 %v120_v47, %v120_v47 }
  0x49   :  { %v123_v52 = vmul.f32 %v121_v49, %v121_v49 }
  0x4a   :  { %v124_v53 = vmul.f32 %v122_v51, %v122_v51 }
  0x4b   :  { %v125_v54 = vmul.f32 %v123_v52, %v101_v48 }
  0x4c   :  { %v126_v55 = vmul.f32 %v124_v53, %v102_v50 }
  0x4e   :  { %v134_v56 = vadd.f32 %v126_v55, %v125_v54 }
  0x50   :  { %137 = vst [vmem:[#allocation7] sm:$0xff] %v134_v56 }
  0x51   :  { %253 = shalt.err (!%p250_p0)
}
  0x52   :  { %171 = dma.vmem_to_hbm [thread:$0]  %s169_s1, 128, %s299_s2, [#allocation4]  }
  0x53   :  { %266 = dma.done.wait [#allocation4], 128  }
  0x54   :  { %267 = vsyncadd [#allocation4], 4294967168 }
  0x55   :  { %175 = vsyncpa [#allocation3], 1 }
  0x56   :  { %176 = vsyncpa [#allocation6], 1 }
  0x57   :  { %177 = vsyncpa [#allocation4], 1 }

</bundles_post_ra>
